<compile_context>
chip_gen: v7x
topology: tpu7x:2x2x1
jax: 0.10.0
libtpu: 0.0.40
codegen_flags: <defaults>
</compile_context>

<pallas_src>
import jax
import jax.numpy as jnp
from jax.experimental import pallas as pl
from jax.experimental.pallas import tpu as pltpu


def moe_fused_kernel(gate_ref, agg_ref, w1_ref, b1_ref, w2_ref, b2_ref,
                     exp_ref, o_ref):
    """Fused gated mixture of K expert MLPs over one row tile of flat nodes.

    gate_ref: (T, K)      f32   per-row mixture weights
    agg_ref : (T, D)      bf16  graph-aggregated features (adj @ z), flattened
    w1_ref  : (D, K*H)    bf16  all experts' first layer, column j <-> expert j%K
    b1_ref  : (1, K*H)    f32
    w2_ref  : (K*H, D)    bf16  all experts' second layer (same column order)
    b2_ref  : (K, D)      f32
    exp_ref : (K, K*H)    f32   0/1 gate expansion: exp[k, j] = (j % K == k)
    o_ref   : (T, D)      f32
    """
    agg = agg_ref[...]                      # (T, D)  bf16, loaded once
    gate = gate_ref[...]                    # (T, K)  f32

    # Layer 1 for all experts in one matmul: (T, D) @ (D, K*H) -> (T, K*H),
    # single bias add, single tanh.
    # NOTE(v5e): tanh over (T, K*H) f32 goes through the single EUP slot; if
    # profiling shows EUP saturating before the 128x128 MXU, shrink tile_rows.
    h = jnp.tanh(
        jnp.dot(agg, w1_ref[...], preferred_element_type=jnp.float32)
        + b1_ref[...])

    # Lane-dense gate broadcast: gate (T, K) @ expand (K, K*H) -> (T, K*H)
    # where column j carries gate[:, j % K].  One tiny MXU pass per tile.
    gate_rep = jnp.dot(gate, exp_ref[...], preferred_element_type=jnp.float32)
    hg = (h * gate_rep).astype(jnp.bfloat16)

    # Layer 2 + gated sum over experts in a single contraction-(K*H) matmul,
    # plus the gated bias term gate @ b2.
    y = jnp.dot(hg, w2_ref[...], preferred_element_type=jnp.float32)
    y = y + jnp.dot(gate, b2_ref[...], preferred_element_type=jnp.float32)
    o_ref[...] = y.astype(o_ref.dtype)


def _const_spec(shape, single_buffered):
    """Constant-index (fetched-once) block; single-buffered when supported."""
    index_map = lambda i: (0,) * len(shape)
    if single_buffered:
        # Constant-index blocks don't need double buffering -> halve their VMEM.
        return pl.BlockSpec(shape, index_map,
                            pipeline_mode=pl.Buffered(buffer_count=1))
    return pl.BlockSpec(shape, index_map)


def graph_ode_func_forward(z, gate, adj, w1, b1, w2, b2, backwards=False,
                           tile_rows=None):
    B, N, D = z.shape
    K = gate.shape[-1]
    H = w1.shape[-1]
    BN = B * N
    KH = K * H

    # Graph aggregation (shared by all experts) hoisted out of the expert math.
    # bf16 operands + f32 accumulate: the result is consumed in bf16 by the MXU
    # anyway, so HIGHEST-precision f32 emulation would be wasted passes.
    # TODO(synk): optionally fuse this matmul into the kernel (block over B) to
    #             avoid the HBM round-trip of agg; kept in the wrapper to retain
    #             flexible flat-[B*N] row tiling for arbitrary B / N.
    agg = jnp.einsum('mn,bnd->bmd',
                     adj.astype(jnp.bfloat16), z.astype(jnp.bfloat16),
                     preferred_element_type=jnp.float32)
    agg2 = agg.reshape(BN, D).astype(jnp.bfloat16)
    gate2 = gate.reshape(BN, K).astype(jnp.float32)

    # Lane-dense fused weight layouts; column j <-> (expert j % K, hidden j // K).
    w1f = jnp.transpose(w1, (1, 2, 0)).reshape(D, KH).astype(jnp.bfloat16)
    b1f = jnp.transpose(b1, (1, 0)).reshape(1, KH).astype(jnp.float32)
    w2f = jnp.transpose(w2, (1, 0, 2)).reshape(KH, D).astype(jnp.bfloat16)
    b2f = b2.astype(jnp.float32)                                   # (K, D)
    expand = (jnp.arange(KH)[None, :] % K
              == jnp.arange(K)[:, None]).astype(jnp.float32)       # (K, K*H)

    # --- VMEM budgeting / row-tile selection -------------------------------
    # Per-row bytes: double-buffered pipelined tiles (gate, agg, out) plus the
    # in-kernel f32/bf16 activations (h, gate_rep, hg, y).
    bytes_per_row = 2 * (K * 4 + D * 2 + D * 4) + KH * (4 + 4 + 2) + D * 4
    weight_bytes = D * KH * 2 + KH * 4 + KH * D * 2 + K * D * 4 + K * KH * 4
    vmem_budget = 32 * 1024 * 1024          # conservative: fits v5e/v6e/v7x

    if tile_rows is None:
        cands = [t for t in range(8, min(BN, 1024) + 1, 8)
                 if BN % t == 0
                 and weight_bytes + t * bytes_per_row <= vmem_budget]
        multi = [t for t in cands if BN // t >= 2]   # v7x: 2 TensorCores
        if multi:
            tile_rows = max(multi)
        elif cands:
            tile_rows = max(cands)
        else:
            tile_rows = BN                  # tiny / oddly shaped problem
    if BN % tile_rows != 0 or (tile_rows % 8 != 0 and tile_rows != BN):
        tile_rows = BN
    grid = (BN // tile_rows,)

    est = weight_bytes + tile_rows * bytes_per_row
    vmem_limit = int(min(48 * 1024 * 1024, max(16 * 1024 * 1024, 2 * est)))

    def run(single_buffered_weights):
        in_specs = [
            pl.BlockSpec((tile_rows, K), lambda i: (i, 0)),    # gate (1 DMA/tile)
            pl.BlockSpec((tile_rows, D), lambda i: (i, 0)),    # agg = adj @ z
            _const_spec((D, KH), single_buffered_weights),     # W1 fused
            _const_spec((1, KH), single_buffered_weights),     # b1 fused
            _const_spec((KH, D), single_buffered_weights),     # W2 fused
            _const_spec((K, D), single_buffered_weights),      # b2
            _const_spec((K, KH), single_buffered_weights),     # gate expansion
        ]
        return pl.pallas_call(
            moe_fused_kernel,
            out_shape=jax.ShapeDtypeStruct((BN, D), jnp.float32),
            grid=grid,
            in_specs=in_specs,
            out_specs=pl.BlockSpec((tile_rows, D), lambda i: (i, 0)),
            compiler_params=pltpu.CompilerParams(
                dimension_semantics=("parallel",),
                vmem_limit_bytes=vmem_limit),
        )(gate2, agg2, w1f, b1f, w2f, b2f, expand)

    try:
        out = run(True)
    except Exception:
        # Installed jax without BlockSpec.pipeline_mode / Buffered(1): fall back
        # to default double-buffered weight blocks (identical results).
        out = run(False)

    grad = out.reshape(B, N, D).astype(z.dtype)
    if backwards:
        grad = -grad
    return grad


def reference_forward(z, gate, adj, w1, b1, w2, b2, backwards=False):
    hi = jax.lax.Precision.HIGHEST
    agg = jnp.einsum('mn,bnd->bmd', adj, z, precision=hi)
    h = jnp.tanh(jnp.einsum('bnd,kdh->kbnh', agg, w1, precision=hi)
                 + b1[:, None, None, :])
    y = (jnp.einsum('kbnh,khd->kbnd', h, w2, precision=hi)
         + b2[:, None, None, :])
    grad = jnp.sum(jnp.transpose(gate, (2, 0, 1))[..., None] * y, axis=0)
    return -grad if backwards else grad


if __name__ == "__main__":
    B, N, D, H, K = 2, 8, 32, 64, 4

    key = jax.random.PRNGKey(0)
    k_z, k_g, k_a, k_w1, k_b1, k_w2, k_b2 = jax.random.split(key, 7)

    z = jax.random.normal(k_z, (B, N, D), dtype=jnp.float32)
    gate_logits = jax.random.normal(k_g, (B, N, K), dtype=jnp.float32)
    gate = jax.nn.softmax(gate_logits, axis=-1)          # mixture weights
    # Row-normalized random adjacency (shared across experts / batches).
    adj_raw = jax.nn.sigmoid(jax.random.normal(k_a, (N, N), dtype=jnp.float32))
    adj = adj_raw / jnp.sum(adj_raw, axis=-1, keepdims=True)

    w1 = 0.1 * jax.random.normal(k_w1, (K, D, H), dtype=jnp.float32)
    b1 = 0.1 * jax.random.normal(k_b1, (K, H), dtype=jnp.float32)
    w2 = 0.1 * jax.random.normal(k_w2, (K, H, D), dtype=jnp.float32)
    b2 = 0.1 * jax.random.normal(k_b2, (K, D), dtype=jnp.float32)

    grad = graph_ode_func_forward(z, gate, adj, w1, b1, w2, b2)
    grad = jax.block_until_ready(grad)

    ref = reference_forward(z, gate, adj, w1, b1, w2, b2)
    assert grad.shape == (B, N, D)
    assert jnp.max(jnp.abs(grad - ref)) < 1e-2, "mismatch vs reference"

    print("KERNEL_OK")
</pallas_src>

<mosaic_0001>
module attributes {stable_mosaic.version = 11 : i64} {
  func.func @moe_fused_kernel(%arg0: i32, %arg1: memref<8x4xf32, #tpu.memory_space<vmem>>, %arg2: memref<8x32xbf16, #tpu.memory_space<vmem>>, %arg3: memref<32x256xbf16, #tpu.memory_space<vmem>>, %arg4: memref<1x256xf32, #tpu.memory_space<vmem>>, %arg5: memref<256x32xbf16, #tpu.memory_space<vmem>>, %arg6: memref<4x32xf32, #tpu.memory_space<vmem>>, %arg7: memref<4x256xf32, #tpu.memory_space<vmem>>, %arg8: memref<8x32xf32, #tpu.memory_space<vmem>>) attributes {dimension_semantics = [#tpu.dimension_semantics<parallel>], iteration_bounds = array<i64: 2>, scalar_prefetch = 0 : i64, scratch_operands = 0 : i64, tpu.core_type = #tpu.core_type<tc>, window_params = [{transform_indices = @transform_0, window_bounds = array<i64: 8, 4>}, {transform_indices = @transform_1, window_bounds = array<i64: 8, 32>}, {pipeline_mode = #tpu.pipeline_mode<synchronous>, transform_indices = @transform_2, window_bounds = array<i64: 32, 256>}, {pipeline_mode = #tpu.pipeline_mode<synchronous>, transform_indices = @transform_3, window_bounds = array<i64: 1, 256>}, {pipeline_mode = #tpu.pipeline_mode<synchronous>, transform_indices = @transform_4, window_bounds = array<i64: 256, 32>}, {pipeline_mode = #tpu.pipeline_mode<synchronous>, transform_indices = @transform_5, window_bounds = array<i64: 4, 32>}, {pipeline_mode = #tpu.pipeline_mode<synchronous>, transform_indices = @transform_6, window_bounds = array<i64: 4, 256>}, {transform_indices = @transform_7, window_bounds = array<i64: 8, 32>}]} {
    %c0 = arith.constant 0 : index
    %c0_0 = arith.constant 0 : index
    %0 = vector.load %arg2[%c0, %c0_0] : memref<8x32xbf16, #tpu.memory_space<vmem>>, vector<8x32xbf16>
    %c0_1 = arith.constant 0 : index
    %c0_2 = arith.constant 0 : index
    %1 = vector.load %arg1[%c0_1, %c0_2] : memref<8x4xf32, #tpu.memory_space<vmem>>, vector<8x4xf32>
    %c0_3 = arith.constant 0 : index
    %c0_4 = arith.constant 0 : index
    %2 = vector.load %arg3[%c0_3, %c0_4] : memref<32x256xbf16, #tpu.memory_space<vmem>>, vector<32x256xbf16>
    %cst = arith.constant dense<0.000000e+00> : vector<8x256xf32>
    %3 = tpu.matmul %0, %2, %cst {dimension_numbers = #tpu.dot_dimension_numbers<[1], [0], [0], [1], [0, 0, 1, 1], [], []>} : vector<8x32xbf16>, vector<32x256xbf16>, vector<8x256xf32> -> vector<8x256xf32>
    %c0_5 = arith.constant 0 : index
    %c0_6 = arith.constant 0 : index
    %4 = vector.load %arg4[%c0_5, %c0_6] : memref<1x256xf32, #tpu.memory_space<vmem>>, vector<1x256xf32>
    %5 = vector.broadcast %4 : vector<1x256xf32> to vector<8x256xf32>
    %6 = arith.addf %3, %5 : vector<8x256xf32>
    %7 = math.tanh %6 : vector<8x256xf32>
    %c0_7 = arith.constant 0 : index
    %c0_8 = arith.constant 0 : index
    %8 = vector.load %arg7[%c0_7, %c0_8] : memref<4x256xf32, #tpu.memory_space<vmem>>, vector<4x256xf32>
    %cst_9 = arith.constant dense<0.000000e+00> : vector<8x256xf32>
    %9 = tpu.matmul %1, %8, %cst_9 {dimension_numbers = #tpu.dot_dimension_numbers<[1], [0], [0], [1], [0, 0, 1, 1], [], []>} : vector<8x4xf32>, vector<4x256xf32>, vector<8x256xf32> -> vector<8x256xf32>
    %10 = arith.mulf %7, %9 : vector<8x256xf32>
    %11 = arith.truncf %10 : vector<8x256xf32> to vector<8x256xbf16>
    %c0_10 = arith.constant 0 : index
    %c0_11 = arith.constant 0 : index
    %12 = vector.load %arg5[%c0_10, %c0_11] : memref<256x32xbf16, #tpu.memory_space<vmem>>, vector<256x32xbf16>
    %cst_12 = arith.constant dense<0.000000e+00> : vector<8x32xf32>
    %13 = tpu.matmul %11, %12, %cst_12 {dimension_numbers = #tpu.dot_dimension_numbers<[1], [0], [0], [1], [0, 0, 1, 1], [], []>} : vector<8x256xbf16>, vector<256x32xbf16>, vector<8x32xf32> -> vector<8x32xf32>
    %c0_13 = arith.constant 0 : index
    %c0_14 = arith.constant 0 : index
    %14 = vector.load %arg6[%c0_13, %c0_14] : memref<4x32xf32, #tpu.memory_space<vmem>>, vector<4x32xf32>
    %cst_15 = arith.constant dense<0.000000e+00> : vector<8x32xf32>
    %15 = tpu.matmul %1, %14, %cst_15 {dimension_numbers = #tpu.dot_dimension_numbers<[1], [0], [0], [1], [0, 0, 1, 1], [], []>} : vector<8x4xf32>, vector<4x32xf32>, vector<8x32xf32> -> vector<8x32xf32>
    %16 = arith.addf %13, %15 : vector<8x32xf32>
    %c0_16 = arith.constant 0 : index
    %c0_17 = arith.constant 0 : index
    %17 = vector.load %arg8[%c0_16, %c0_17] : memref<8x32xf32, #tpu.memory_space<vmem>>, vector<8x32xf32>
    tpu.vector_store %arg8[%c0_16, %c0_17], %16 {strides = array<i32>} : memref<8x32xf32, #tpu.memory_space<vmem>>, vector<8x32xf32>,
    return
  }
  func.func @transform_0(%arg0: i32) -> (i32, i32) {
    %c0_i32 = arith.constant 0 : i32
    %c0_i32_0 = arith.constant 0 : i32
    return %arg0, %c0_i32 : i32, i32
  }
  func.func @transform_1(%arg0: i32) -> (i32, i32) {
    %c0_i32 = arith.constant 0 : i32
    %c0_i32_0 = arith.constant 0 : i32
    return %arg0, %c0_i32 : i32, i32
  }
  func.func @transform_2(%arg0: i32) -> (i32, i32) {
    %c0_i32 = arith.constant 0 : i32
    %c0_i32_0 = arith.constant 0 : i32
    %c0_i32_1 = arith.constant 0 : i32
    return %c0_i32, %c0_i32_0 : i32, i32
  }
  func.func @transform_3(%arg0: i32) -> (i32, i32) {
    %c0_i32 = arith.constant 0 : i32
    %c0_i32_0 = arith.constant 0 : i32
    %c0_i32_1 = arith.constant 0 : i32
    return %c0_i32, %c0_i32_0 : i32, i32
  }
  func.func @transform_4(%arg0: i32) -> (i32, i32) {
    %c0_i32 = arith.constant 0 : i32
    %c0_i32_0 = arith.constant 0 : i32
    %c0_i32_1 = arith.constant 0 : i32
    return %c0_i32, %c0_i32_0 : i32, i32
  }
  func.func @transform_5(%arg0: i32) -> (i32, i32) {
    %c0_i32 = arith.constant 0 : i32
    %c0_i32_0 = arith.constant 0 : i32
    %c0_i32_1 = arith.constant 0 : i32
    return %c0_i32, %c0_i32_0 : i32, i32
  }
  func.func @transform_6(%arg0: i32) -> (i32, i32) {
    %c0_i32 = arith.constant 0 : i32
    %c0_i32_0 = arith.constant 0 : i32
    %c0_i32_1 = arith.constant 0 : i32
    return %c0_i32, %c0_i32_0 : i32, i32
  }
  func.func @transform_7(%arg0: i32) -> (i32, i32) {
    %c0_i32 = arith.constant 0 : i32
    %c0_i32_0 = arith.constant 0 : i32
    return %arg0, %c0_i32 : i32, i32
  }
}

module attributes {stable_mosaic.version = 11 : i64} {
  func.func @moe_fused_kernel(%arg0: i32, %arg1: memref<8x4xf32, #tpu.memory_space<vmem>>, %arg2: memref<8x32xbf16, #tpu.memory_space<vmem>>, %arg3: memref<32x256xbf16, #tpu.memory_space<vmem>>, %arg4: memref<1x256xf32, #tpu.memory_space<vmem>>, %arg5: memref<256x32xbf16, #tpu.memory_space<vmem>>, %arg6: memref<4x32xf32, #tpu.memory_space<vmem>>, %arg7: memref<4x256xf32, #tpu.memory_space<vmem>>, %arg8: memref<8x32xf32, #tpu.memory_space<vmem>>) attributes {dimension_semantics = [#tpu.dimension_semantics<parallel>], iteration_bounds = array<i64: 2>, scalar_prefetch = 0 : i64, scratch_operands = 0 : i64, tpu.core_type = #tpu.core_type<tc>, window_params = [{transform_indices = @transform_0, window_bounds = array<i64: 8, 4>}, {transform_indices = @transform_1, window_bounds = array<i64: 8, 32>}, {pipeline_mode = #tpu.pipeline_mode<synchronous>, transform_indices = @transform_2, window_bounds = array<i64: 32, 256>}, {pipeline_mode = #tpu.pipeline_mode<synchronous>, transform_indices = @transform_3, window_bounds = array<i64: 1, 256>}, {pipeline_mode = #tpu.pipeline_mode<synchronous>, transform_indices = @transform_4, window_bounds = array<i64: 256, 32>}, {pipeline_mode = #tpu.pipeline_mode<synchronous>, transform_indices = @transform_5, window_bounds = array<i64: 4, 32>}, {pipeline_mode = #tpu.pipeline_mode<synchronous>, transform_indices = @transform_6, window_bounds = array<i64: 4, 256>}, {transform_indices = @transform_7, window_bounds = array<i64: 8, 32>}]} {
    %c0 = arith.constant 0 : index
    %c0_0 = arith.constant 0 : index
    %0 = vector.load %arg2[%c0, %c0_0] : memref<8x32xbf16, #tpu.memory_space<vmem>>, vector<8x32xbf16>
    %c0_1 = arith.constant 0 : index
    %c0_2 = arith.constant 0 : index
    %1 = vector.load %arg1[%c0_1, %c0_2] : memref<8x4xf32, #tpu.memory_space<vmem>>, vector<8x4xf32>
    %c0_3 = arith.constant 0 : index
    %c0_4 = arith.constant 0 : index
    %2 = vector.load %arg3[%c0_3, %c0_4] : memref<32x256xbf16, #tpu.memory_space<vmem>>, vector<32x256xbf16>
    %cst = arith.constant dense<0.000000e+00> : vector<8x256xf32>
    %3 = tpu.matmul %0, %2, %cst {dimension_numbers = #tpu.dot_dimension_numbers<[1], [0], [0], [1], [0, 0, 1, 1], [], []>} : vector<8x32xbf16>, vector<32x256xbf16>, vector<8x256xf32> -> vector<8x256xf32>
    %c0_5 = arith.constant 0 : index
    %c0_6 = arith.constant 0 : index
    %4 = vector.load %arg4[%c0_5, %c0_6] : memref<1x256xf32, #tpu.memory_space<vmem>>, vector<1x256xf32>
    %5 = vector.broadcast %4 : vector<1x256xf32> to vector<8x256xf32>
    %6 = arith.addf %3, %5 : vector<8x256xf32>
    %7 = math.tanh %6 : vector<8x256xf32>
    %c0_7 = arith.constant 0 : index
    %c0_8 = arith.constant 0 : index
    %8 = vector.load %arg7[%c0_7, %c0_8] : memref<4x256xf32, #tpu.memory_space<vmem>>, vector<4x256xf32>
    %cst_9 = arith.constant dense<0.000000e+00> : vector<8x256xf32>
    %9 = tpu.matmul %1, %8, %cst_9 {dimension_numbers = #tpu.dot_dimension_numbers<[1], [0], [0], [1], [0, 0, 1, 1], [], []>} : vector<8x4xf32>, vector<4x256xf32>, vector<8x256xf32> -> vector<8x256xf32>
    %10 = arith.mulf %7, %9 : vector<8x256xf32>
    %11 = arith.truncf %10 : vector<8x256xf32> to vector<8x256xbf16>
    %c0_10 = arith.constant 0 : index
    %c0_11 = arith.constant 0 : index
    %12 = vector.load %arg5[%c0_10, %c0_11] : memref<256x32xbf16, #tpu.memory_space<vmem>>, vector<256x32xbf16>
    %cst_12 = arith.constant dense<0.000000e+00> : vector<8x32xf32>
    %13 = tpu.matmul %11, %12, %cst_12 {dimension_numbers = #tpu.dot_dimension_numbers<[1], [0], [0], [1], [0, 0, 1, 1], [], []>} : vector<8x256xbf16>, vector<256x32xbf16>, vector<8x32xf32> -> vector<8x32xf32>
    %c0_13 = arith.constant 0 : index
    %c0_14 = arith.constant 0 : index
    %14 = vector.load %arg6[%c0_13, %c0_14] : memref<4x32xf32, #tpu.memory_space<vmem>>, vector<4x32xf32>
    %cst_15 = arith.constant dense<0.000000e+00> : vector<8x32xf32>
    %15 = tpu.matmul %1, %14, %cst_15 {dimension_numbers = #tpu.dot_dimension_numbers<[1], [0], [0], [1], [0, 0, 1, 1], [], []>} : vector<8x4xf32>, vector<4x32xf32>, vector<8x32xf32> -> vector<8x32xf32>
    %16 = arith.addf %13, %15 : vector<8x32xf32>
    %c0_16 = arith.constant 0 : index
    %c0_17 = arith.constant 0 : index
    %17 = vector.load %arg8[%c0_16, %c0_17] : memref<8x32xf32, #tpu.memory_space<vmem>>, vector<8x32xf32>
    tpu.vector_store %arg8[%c0_16, %c0_17], %16 {strides = array<i32>} : memref<8x32xf32, #tpu.memory_space<vmem>>, vector<8x32xf32>,
    return
  }
  func.func @transform_0(%arg0: i32) -> (i32, i32) {
    %c0_i32 = arith.constant 0 : i32
    %c0_i32_0 = arith.constant 0 : i32
    return %arg0, %c0_i32 : i32, i32
  }
  func.func @transform_1(%arg0: i32) -> (i32, i32) {
    %c0_i32 = arith.constant 0 : i32
    %c0_i32_0 = arith.constant 0 : i32
    return %arg0, %c0_i32 : i32, i32
  }
  func.func @transform_2(%arg0: i32) -> (i32, i32) {
    %c0_i32 = arith.constant 0 : i32
    %c0_i32_0 = arith.constant 0 : i32
    %c0_i32_1 = arith.constant 0 : i32
    return %c0_i32, %c0_i32_0 : i32, i32
  }
  func.func @transform_3(%arg0: i32) -> (i32, i32) {
    %c0_i32 = arith.constant 0 : i32
    %c0_i32_0 = arith.constant 0 : i32
    %c0_i32_1 = arith.constant 0 : i32
    return %c0_i32, %c0_i32_0 : i32, i32
  }
  func.func @transform_4(%arg0: i32) -> (i32, i32) {
    %c0_i32 = arith.constant 0 : i32
    %c0_i32_0 = arith.constant 0 : i32
    %c0_i32_1 = arith.constant 0 : i32
    return %c0_i32, %c0_i32_0 : i32, i32
  }
  func.func @transform_5(%arg0: i32) -> (i32, i32) {
    %c0_i32 = arith.constant 0 : i32
    %c0_i32_0 = arith.constant 0 : i32
    %c0_i32_1 = arith.constant 0 : i32
    return %c0_i32, %c0_i32_0 : i32, i32
  }
  func.func @transform_6(%arg0: i32) -> (i32, i32) {
    %c0_i32 = arith.constant 0 : i32
    %c0_i32_0 = arith.constant 0 : i32
    %c0_i32_1 = arith.constant 0 : i32
    return %c0_i32, %c0_i32_0 : i32, i32
  }
  func.func @transform_7(%arg0: i32) -> (i32, i32) {
    %c0_i32 = arith.constant 0 : i32
    %c0_i32_0 = arith.constant 0 : i32
    return %arg0, %c0_i32 : i32, i32
  }
}

</mosaic_0001>

<bundles_post_ra>
// kernel: tpu_custom_call.1
= control target key start
LH: loop header
LB: loop body
LE: loop exit
PB: predicated region body
PF: predicated region fallthrough
CT: control target
= control target key end

     0   :  { %12 = vsyncpa [#allocation3], 0  ;;  %s1214_s0 = inlined_call_operand.vmem [shape: f32[16,4], index: 0, kind: input, shape index: {}]   ;;  %s1215_s1 = inlined_call_operand.vmem [shape: bf16[16,32], index: 1, kind: input, shape index: {}]   ;;  %s1216_s2 = inlined_call_operand.vmem [shape: bf16[32,256], index: 2, kind: input, shape index: {}]   ;;  %s1217_s3 = inlined_call_operand.vmem [shape: f32[1,256], index: 3, kind: input, shape index: {}]   ;;  %s1218_s4 = inlined_call_operand.vmem [shape: bf16[256,32], index: 4, kind: input, shape index: {}]   ;;  %s1219_s5 = inlined_call_operand.vmem [shape: f32[4,32], index: 5, kind: input, shape index: {}]   ;;  %s1220_s6 = inlined_call_operand.vmem [shape: f32[4,256], index: 6, kind: input, shape index: {}]   ;;  %s1221_s7 = inlined_call_operand.hbm [shape: f32[16,32], index: 7, kind: output, shape index: {}]  }
   0x1   :  { %14 = vsyncpa [#allocation3 + $0x1], 0  ;;  %s1035_s24 = smov 0   ;;  %s1037_s25 = smov 0  }
   0x2   :  { %s1039_s26 = smov 0   ;;  %s1041_s27 = smov 0  }
   0x3 LB: > { %s1056_s28 = sadd.s32 4294967295, %s989_s27   ;;  %s792_s29 = sadd.s32 4294967294, %s989_s27   ;;  %s989_s27 = sphi %s1041_s27, %s1227_s27   ;;  %s985_s26 = sphi %s1039_s26, %s1226_s26   ;;  %s981_s25 = sphi %s1037_s25, %s1225_s25   ;;  %s977_s24 = sphi %s1035_s24, %s1224_s24  }
   0x4   : > { %s1060_s30 = sadd.s32 1, %s989_s27   ;;  %s184_s8 = sadd.s32 1, %s985_s26 }
   0x5   : > { %s181_s9 = ssub.s32 %s989_s27, %s1060_s30  ;;  %p194_p0 = scmp.ne.s32.totalorder %s985_s26, %s981_s25 }
   0x6   : > { %p182_p1 = scmp.eq.s32.totalorder %s181_s9, 0  ;;  %p195_p2 = scmp.eq.s32.totalorder %s1056_s28, 1 }
   0x7   : > { %p200_p3 = scmp.ne.s32.totalorder %s981_s25, %s977_s24  ;;  %p201_p4 = scmp.eq.s32.totalorder %s792_s29, 1 }
   0x8   : > { %s1071_s10 = scalar_select %p182_p1, %s985_s26, %s184_s8  }
   0x9   : > { %p1073_p5 = por %p195_p2, %p194_p0  ;;  %p1077_p6 = por %p201_p4, %p200_p3 }
   0xa   : > { %p795_p7 = scmp.ge.s32.totalorder %s989_s27, 1  ;;  %p248_p8 = scmp.lt.s32.totalorder %s989_s27, 3 }
   0xc   : > { %p249_p9 = pnand %p795_p7, %p248_p8 }
   0xd   : > { %v900_v0 = vld [vmem:[%s1216_s2 + $0x4] ss:$8 sps:$4 sm:$0xff] (!%p249_p9)   ;;  %p283_p10 = scmp.lt.s32.totalorder (!%p249_p9), %s1056_s28, 1  ;;  %v902_v1 = vld [vmem:[%s1216_s2] ss:$8 sps:$4 sm:$0xff] (!%p249_p9)   ;;  %v991_v2 = vmov (!%p249_p9), 0   ;;  %v300_v27 = vlaneseq (!%p249_p9) }
   0xe   : > { %252 = sbr.rel (%p249_p9) target bundleno = 488 (0x1e8), region = 48  ;;  %366 = vmatprep.mubr.bf16.mxu0 (!%p249_p9), %v991_v2  ;;  %334 = vmatprep.subr.bf16.mxu0 (!%p249_p9), %v900_v0  ;;  %v903_v3 = vld [vmem:[%s1216_s2 + $0x14] ss:$8 sps:$4 sm:$0xff] (!%p249_p9)   ;;  %v377_v4 = vld [vmem:[%s1220_s6] sm:$0xff] (!%p249_p9)  ;;  %v905_v5 = vld [vmem:[%s1216_s2 + $0x10] ss:$8 sps:$4 sm:$0xff] (!%p249_p9)  }
   0xf   : > { %335 = vmatpush1.bf16.msra.mxu0 (!%p249_p9), %v902_v1  ;;  %v379_v6 = vcombine.high (!%p249_p9), %v377_v4, %v377_v4  ;;  %vm384_vm0 = vcmask (!%p249_p9), 1043456   ;;  %v907_v7 = vld [vmem:[%s1218_s4 + $0x40] sm:$0xff] (!%p249_p9)   ;;  %vm330_vm1 = vcmask (!%p249_p9), 261120   ;;  %v909_v9 = vld [vmem:[%s1218_s4 + $0x48] sm:$0xff] (!%p249_p9)   ;;  %v911_v12 = vld [vmem:[%s1218_s4 + $0x50] sm:$0xff] (!%p249_p9)   ;;  %vm380_vm2 = vcmask (!%p249_p9), 31744  }
  0x10   : > { %336 = vmatprep.subr.bf16.mxu0 (!%p249_p9), %v903_v3  ;;  %v908_v8 = vld [vmem:[%s1218_s4] sm:$0xff] (!%p249_p9)   ;;  %831 = vmatprep.subr.bf16.mxu1 (!%p249_p9), %v907_v7  ;;  %v910_v11 = vld [vmem:[%s1218_s4 + $0x8] sm:$0xff] (!%p249_p9)   ;;  %v912_v13 = vld [vmem:[%s1218_s4 + $0x10] sm:$0xff] (!%p249_p9)   ;;  %v992_v14 = vmov (!%p249_p9), 0.0   ;;  %vm993_vm3 = vmmov (!%p249_p9), 0   ;;  %v301_v28 = vshrl.u32 (!%p249_p9), %v300_v27, 7 }
  0x11   : > { %832 = vmatpush3.bf16.msra.mxu1 (!%p249_p9), %v908_v8  ;;  %v913_v16 = vld [vmem:[%s1218_s4 + $0x58] sm:$0xff] (!%p249_p9)   ;;  %v915_v18 = vld [vmem:[%s1218_s4 + $0x60] sm:$0xff] (!%p249_p9)   ;;  %v917_v20 = vld [vmem:[%s1218_s4 + $0x68] sm:$0xff] (!%p249_p9)   ;;  %s826_s14 = sshll.u32 (!%p249_p9), %s1056_s28, 7  ;;  %s994_s22 = smov (!%p249_p9), [#allocation2]  }
  0x12   : > { %833 = vmatprep.subr.bf16.mxu1 (!%p249_p9), %v909_v9  ;;  %v914_v17 = vld [vmem:[%s1218_s4 + $0x18] sm:$0xff] (!%p249_p9)   ;;  %v916_v19 = vld [vmem:[%s1218_s4 + $0x20] sm:$0xff] (!%p249_p9)   ;;  %v918_v21 = vld [vmem:[%s1218_s4 + $0x28] sm:$0xff] (!%p249_p9)   ;;  %v302_v29 = vsub.s32 (!%p249_p9), 0, %v301_v28  ;;  %v306_v31 = vsub.s32 (!%p249_p9), 1, %v301_v28  ;;  %s1171_s20 = scalar_lea.hbm (!%p249_p9), %s1221_s7, %s826_s14  ;;  %s931_s23 = sshll.u32 (!%p249_p9), %s994_s22, 4  ;;  %s932_s23 = int_to_ptr.vmem [resolvable:$false] %s931_s23 }
  0x13   : > { %337 = vmatpush1.bf16.msra.mxu0 (!%p249_p9), %v905_v5  ;;  %v919_v22 = vld [vmem:[%s1218_s4 + $0x70] sm:$0xff] (!%p249_p9)   ;;  %v921_v24 = vld [vmem:[%s1218_s4 + $0x78] sm:$0xff] (!%p249_p9)   ;;  %v496_v26 = vld [vmem:[%s1219_s5] sm:$0xf] (!%p249_p9)  ;;  %s933_s8 = scalar_lea.vmem (!%p249_p9), %s932_s23, 256 }
  0x14   : > { %804 = vmatprep.subr.msk.mxu0 (!%p249_p9), %vm384_vm0, %v379_v6  ;;  %v920_v23 = vld [vmem:[%s1218_s4 + $0x30] sm:$0xff] (!%p249_p9)   ;;  %v922_v25 = vld [vmem:[%s1218_s4 + $0x38] sm:$0xff] (!%p249_p9)   ;;  %v298_v30 = vld [vmem:[%s1217_s3] sm:$0x3] (!%p249_p9) }
  0x15   : > { %s284_s19 = scalar_select %p283_p10, %s1056_s28, 1  ;;  %834 = vmatpush3.bf16.msra.mxu1 %v910_v11  ;;  %v303_v32 = vrot.slane %v298_v30, %v302_v29  ;;  %v307_v33 = vrot.slane %v298_v30, %v306_v31 }
  0x16   : > { %835 = vmatprep.subr.bf16.mxu1 %v911_v12 }
  0x17   : > { %s798_s29 = sshll.u32 %s284_s19, 2  ;;  %s797_s18 = sshll.u32 %s284_s19, 3 }
  0x18   : > { %s290_s17 = scalar_lea.vmem %s1215_s1, %s798_s29  ;;  %s286_s13 = scalar_lea.vmem %s1214_s0, %s797_s18 }
  0x19   : > { %v292_v10 = vld [vmem:[%s290_s17] sm:$0xf]  ;;  %836 = vmatpush3.bf16.msra.mxu1 %v912_v13  ;;  %s280_s29 = sand.u32 1, %s981_s25  }
  0x1a   : > { %803 = vmatmul.mubr.msk.bf16.vlgmr.msra.gmra.mrb[0].mxu0 %vm330_vm1, %v292_v10  ;;  %v293_v15 = vld [vmem:[%s286_s13] sm:$0xff]  ;;  %837 = vmatprep.subr.bf16.mxu1 %v913_v16  ;;  %s796_s13 = sshll.u32 %s280_s29, 3  ;;  %s708_s21 = scalar_lea.sflag [#allocation3], %s280_s29 }
  0x1b   : > { %805 = vmatpush1.msk.msra.mxu0 %vm384_vm0, %v377_v4  ;;  %453 = vmatprep.mubr.f32.mxu0 %v992_v14  ;;  %s282_s15 = scalar_lea.vmem [#allocation2], %s796_s13 }
  0x1c   : > { %853 = vmatprep.subr.mxu0 %v992_v14  ;;  %s721_s16 = sshll.u32 %s282_s15, 4  ;;  %s1173_s16 = int_to_ptr.vmem [resolvable:$true] %s721_s16 }
  0x1d   : > { %838 = vmatpush3.bf16.msra.mxu1 %v914_v17  ;;  %s927_s28 = scalar_lea.vmem %s1173_s16, 128  ;;  %p934_p0 = scmp.lt.s32.totalorder %s1173_s16, %s932_s23 }
  0x1e   : > { %839 = vmatprep.subr.bf16.mxu1 %v915_v18  ;;  %p928_p11 = scmp.ne.s32.totalorder %s1173_s16, %s927_s28  ;;  %p935_p1 = scmp.lt.s32.totalorder %s933_s8, %s927_s28 }
  0x20   : > { %p929_p12 = pnand %p928_p11, %p1073_p5  ;;  %p936_p2 = por %p935_p1, %p934_p0 }
  0x21   : > { %840 = vmatpush3.bf16.msra.mxu1 %v916_v19 }
  0x22   : > { %806 = vmatmul.mubr.msk.f32.vlgmr.msra.gmra.mrb[4].mxu0 %vm380_vm2, %v293_v15  ;;  %841 = vmatprep.subr.bf16.mxu1 %v917_v20  ;;  %p930_p13 = pneg %p929_p12 }
  0x23   : > { %854 = vmatpush3.msk.msra.mxu0 %vm384_vm0, %v496_v26  ;;  %855 = vmatprep.mubr.msk.f32.mxu0 %vm993_vm3, %v992_v14 }
  0x24   : > { %p937_p3 = pnand %p936_p2, %p930_p13 }
  0x25   : > { %842 = vmatpush3.bf16.msra.mxu1 %v918_v21 }
  0x26   : > { %843 = vmatprep.subr.bf16.mxu1 %v919_v22  ;;  %856 = vmatmul.mubr.msk.f32.vlgmr.msra.gmra.mrb[6].mxu0 %vm380_vm2, %v293_v15 }
  0x29   : > { %844 = vmatpush3.bf16.msra.mxu1 %v920_v23 }
  0x2a   : > { %845 = vmatprep.subr.bf16.mxu1 %v921_v24 }
  0x2d   : > { %846 = vmatpush3.bf16.msra.mxu1 %v922_v25 }
  0xed   : > { %v368_v34 = vpop.f32.mrb[0].mxu0 }
  0xee   : > { %v369_v35 = vadd.f32 %v368_v34, %v303_v32  ;;  %v370_v36 = vpop.f32.mrb[1].mxu0 }
  0xef   : > { %v371_v37 = vadd.f32 %v370_v36, %v307_v33  ;;  %v372_v38 = vpop.f32.mrb[2].mxu0 }
  0xf0   : > { %923 = vtanh.f32 %v369_v35  ;;  %v373_v39 = vpop.f32.mrb[3].mxu0 }
  0xf1   : > { %925 = vtanh.f32 %v371_v37 }
  0xf5   : > { %v455_v40 = vpop.f32.mrb[4].mxu0 }
  0xf6   : > { %v457_v41 = vpop.f32.mrb[5].mxu0 }
  0xf9   : > { %v566_v48 = vpop.f32.mrb[6].mxu0 }
  0xfa   : > { %v924_v42 = vpop.eup %923  ;;  %v857_v49 = vpop.f32.mrb[7].mxu0 }
  0xfb   : > { %v926_v43 = vpop.eup %925  ;;  %v460_v44 = vmul.f32 %v924_v42, %v455_v40 }
  0xfc   : > { %v461_v45 = vmul.f32 %v926_v43, %v457_v41 }
  0xfd   : > { %v462_v47 = vpack.c.bf16 %v460_v44, %v460_v44 }
  0xfe   : > { %v463_v46 = vpack.c.bf16 %v461_v45, %v461_v45 }
 0x100   : > { %698 = vmatprep.mubr.bf16.mxu1 %v463_v46 }
 0x101   : > { %699 = vmatmul.mubr.bf16.vlgmr.msra.gmra.mrb[0].mxu1 %v462_v47 }
 0x1d4   : > { %v847_v50 = vpop.f32.mrb[0].mxu1 }
 0x1d5   : > { %v848_v51 = vpop.f32.mrb[1].mxu1 }
 0x1d6   : > { %v849_v52 = vadd.f32 %v848_v51, %v847_v50  ;;  %v850_v53 = vpop.f32.mrb[2].mxu1 }
 0x1d7   : > { %v851_v54 = vpop.f32.mrb[3].mxu1 }
 0x1d8   : > { %v701_v55 = vadd.f32 %v849_v52, %v566_v48 }
 0x1da   : > { %706 = vst.msk [vmem:[%s282_s15] sm:$0xff] %vm330_vm1, %v701_v55 }
 0x1db   : > { %940 = shalt.err (!%p937_p3)
}
 0x1dc   : > { %s941_s9 = scalar_lea.hbm %s1171_s20, 128  ;;  %s945_s13 = scalar_lea.hbm %s1221_s7, 256 }
 0x1dd   : > { %p942_p4 = scmp.ne.s32.totalorder %s1171_s20, %s941_s9  ;;  %p946_p9 = scmp.lt.u32.totalorder %s1171_s20, %s1221_s7 }
 0x1de   : > { %p947_p10 = scmp.lt.u32.totalorder %s945_s13, %s941_s9  ;;  %p949_p12 = scmp.lt.u32.totalorder %s941_s9, %s1171_s20 }
 0x1df   : > { %p943_p7 = pnand %p942_p4, %p1073_p5 }
 0x1e0   : > { %p948_p11 = por %p947_p10, %p946_p9 }
 0x1e1   : > { %p944_p8 = pneg %p943_p7 }
 0x1e2   : > { %p950_p13 = por %p949_p12, %p948_p11 }
 0x1e4   : > { %p951_p0 = pnand %p950_p13, %p944_p8 }
 0x1e6   : > { %954 = shalt.err (!%p951_p0)
}
 0x1e7   : > { %858 = dma.vmem_to_hbm [thread:$0]  (%p1073_p5), %s1173_s16, 128, %s1171_s20, %s708_s21  }
 0x1e8 PF: > { %p864_p1 = scmp.ge.s32.totalorder %s989_s27, 2  ;;  %s733_s17 = sand.u32 1, %s977_s24  }
 0x1e9   : > { %s734_s18 = scalar_lea.sflag [#allocation3], %s733_s17 }
 0x1ea   : > { %p861_p2 = pnand %p864_p1, %p1077_p6 }
 0x1ec   : > { %972 = dma.done.wait (!%p861_p2), %s734_s18, 128  }
 0x1ed   : > { %974 = vsyncadd (!%p861_p2), %s734_s18, 4294967168  ;;  %p17_p3 = scmp.ge.s32.totalorder %s1060_s30, 4   ;;  %s1224_s24 = smov %s981_s25 }
 0x1ee   : > { %s1225_s25 = smov %s985_s26  ;;  %s1226_s26 = smov %s1071_s10 }
 0x1ef   : > { %s1227_s27 = smov %s1060_s30  ;;  %19 = sbr.rel (!%p17_p3) target bundleno = 3 (0x3), region = 86 }
 0x1f6   :  { %739 = vsyncpa [#allocation3], 1 }
 0x1f7   :  { %741 = vsyncpa [#allocation3 + $0x1], 1 }

// kernel: tpu_custom_call.1
= control target key start
LH: loop header
LB: loop body
LE: loop exit
PB: predicated region body
PF: predicated region fallthrough
CT: control target
= control target key end

     0   :  { %12 = vsyncpa [#allocation3], 0  ;;  %s1214_s0 = inlined_call_operand.vmem [shape: f32[16,4], index: 0, kind: input, shape index: {}]   ;;  %s1215_s1 = inlined_call_operand.vmem [shape: bf16[16,32], index: 1, kind: input, shape index: {}]   ;;  %s1216_s2 = inlined_call_operand.vmem [shape: bf16[32,256], index: 2, kind: input, shape index: {}]   ;;  %s1217_s3 = inlined_call_operand.vmem [shape: f32[1,256], index: 3, kind: input, shape index: {}]   ;;  %s1218_s4 = inlined_call_operand.vmem [shape: bf16[256,32], index: 4, kind: input, shape index: {}]   ;;  %s1219_s5 = inlined_call_operand.vmem [shape: f32[4,32], index: 5, kind: input, shape index: {}]   ;;  %s1220_s6 = inlined_call_operand.vmem [shape: f32[4,256], index: 6, kind: input, shape index: {}]   ;;  %s1221_s7 = inlined_call_operand.hbm [shape: f32[16,32], index: 7, kind: output, shape index: {}]  }
   0x1   :  { %14 = vsyncpa [#allocation3 + $0x1], 0  ;;  %s1035_s24 = smov 0   ;;  %s1037_s25 = smov 0  }
   0x2   :  { %s1039_s26 = smov 0   ;;  %s1041_s27 = smov 0  }
   0x3 LB: > { %s1056_s28 = sadd.s32 4294967295, %s989_s27   ;;  %s792_s29 = sadd.s32 4294967294, %s989_s27   ;;  %s989_s27 = sphi %s1041_s27, %s1227_s27   ;;  %s985_s26 = sphi %s1039_s26, %s1226_s26   ;;  %s981_s25 = sphi %s1037_s25, %s1225_s25   ;;  %s977_s24 = sphi %s1035_s24, %s1224_s24  }
   0x4   : > { %s1060_s30 = sadd.s32 1, %s989_s27   ;;  %s184_s8 = sadd.s32 1, %s985_s26 }
   0x5   : > { %s181_s9 = ssub.s32 %s989_s27, %s1060_s30  ;;  %p194_p0 = scmp.ne.s32.totalorder %s985_s26, %s981_s25 }
   0x6   : > { %p182_p1 = scmp.eq.s32.totalorder %s181_s9, 0  ;;  %p195_p2 = scmp.eq.s32.totalorder %s1056_s28, 1 }
   0x7   : > { %p200_p3 = scmp.ne.s32.totalorder %s981_s25, %s977_s24  ;;  %p201_p4 = scmp.eq.s32.totalorder %s792_s29, 1 }
   0x8   : > { %s1071_s10 = scalar_select %p182_p1, %s985_s26, %s184_s8  }
   0x9   : > { %p1073_p5 = por %p195_p2, %p194_p0  ;;  %p1077_p6 = por %p201_p4, %p200_p3 }
   0xa   : > { %p795_p7 = scmp.ge.s32.totalorder %s989_s27, 1  ;;  %p248_p8 = scmp.lt.s32.totalorder %s989_s27, 3 }
   0xc   : > { %p249_p9 = pnand %p795_p7, %p248_p8 }
   0xd   : > { %v900_v0 = vld [vmem:[%s1216_s2 + $0x4] ss:$8 sps:$4 sm:$0xff] (!%p249_p9)   ;;  %p283_p10 = scmp.lt.s32.totalorder (!%p249_p9), %s1056_s28, 1  ;;  %v902_v1 = vld [vmem:[%s1216_s2] ss:$8 sps:$4 sm:$0xff] (!%p249_p9)   ;;  %v991_v2 = vmov (!%p249_p9), 0   ;;  %v300_v27 = vlaneseq (!%p249_p9) }
   0xe   : > { %252 = sbr.rel (%p249_p9) target bundleno = 488 (0x1e8), region = 48  ;;  %366 = vmatprep.mubr.bf16.mxu0 (!%p249_p9), %v991_v2  ;;  %334 = vmatprep.subr.bf16.mxu0 (!%p249_p9), %v900_v0  ;;  %v903_v3 = vld [vmem:[%s1216_s2 + $0x14] ss:$8 sps:$4 sm:$0xff] (!%p249_p9)   ;;  %v377_v4 = vld [vmem:[%s1220_s6] sm:$0xff] (!%p249_p9)  ;;  %v905_v5 = vld [vmem:[%s1216_s2 + $0x10] ss:$8 sps:$4 sm:$0xff] (!%p249_p9)  }
   0xf   : > { %335 = vmatpush1.bf16.msra.mxu0 (!%p249_p9), %v902_v1  ;;  %v379_v6 = vcombine.high (!%p249_p9), %v377_v4, %v377_v4  ;;  %vm384_vm0 = vcmask (!%p249_p9), 1043456   ;;  %v907_v7 = vld [vmem:[%s1218_s4 + $0x40] sm:$0xff] (!%p249_p9)   ;;  %vm330_vm1 = vcmask (!%p249_p9), 261120   ;;  %v909_v9 = vld [vmem:[%s1218_s4 + $0x48] sm:$0xff] (!%p249_p9)   ;;  %v911_v12 = vld [vmem:[%s1218_s4 + $0x50] sm:$0xff] (!%p249_p9)   ;;  %vm380_vm2 = vcmask (!%p249_p9), 31744  }
  0x10   : > { %336 = vmatprep.subr.bf16.mxu0 (!%p249_p9), %v903_v3  ;;  %v908_v8 = vld [vmem:[%s1218_s4] sm:$0xff] (!%p249_p9)   ;;  %831 = vmatprep.subr.bf16.mxu1 (!%p249_p9), %v907_v7  ;;  %v910_v11 = vld [vmem:[%s1218_s4 + $0x8] sm:$0xff] (!%p249_p9)   ;;  %v912_v13 = vld [vmem:[%s1218_s4 + $0x10] sm:$0xff] (!%p249_p9)   ;;  %v992_v14 = vmov (!%p249_p9), 0.0   ;;  %vm993_vm3 = vmmov (!%p249_p9), 0   ;;  %v301_v28 = vshrl.u32 (!%p249_p9), %v300_v27, 7 }
  0x11   : > { %832 = vmatpush3.bf16.msra.mxu1 (!%p249_p9), %v908_v8  ;;  %v913_v16 = vld [vmem:[%s1218_s4 + $0x58] sm:$0xff] (!%p249_p9)   ;;  %v915_v18 = vld [vmem:[%s1218_s4 + $0x60] sm:$0xff] (!%p249_p9)   ;;  %v917_v20 = vld [vmem:[%s1218_s4 + $0x68] sm:$0xff] (!%p249_p9)   ;;  %s826_s14 = sshll.u32 (!%p249_p9), %s1056_s28, 7  ;;  %s994_s22 = smov (!%p249_p9), [#allocation2]  }
  0x12   : > { %833 = vmatprep.subr.bf16.mxu1 (!%p249_p9), %v909_v9  ;;  %v914_v17 = vld [vmem:[%s1218_s4 + $0x18] sm:$0xff] (!%p249_p9)   ;;  %v916_v19 = vld [vmem:[%s1218_s4 + $0x20] sm:$0xff] (!%p249_p9)   ;;  %v918_v21 = vld [vmem:[%s1218_s4 + $0x28] sm:$0xff] (!%p249_p9)   ;;  %v302_v29 = vsub.s32 (!%p249_p9), 0, %v301_v28  ;;  %v306_v31 = vsub.s32 (!%p249_p9), 1, %v301_v28  ;;  %s1171_s20 = scalar_lea.hbm (!%p249_p9), %s1221_s7, %s826_s14  ;;  %s931_s23 = sshll.u32 (!%p249_p9), %s994_s22, 4  ;;  %s932_s23 = int_to_ptr.vmem [resolvable:$false] %s931_s23 }
  0x13   : > { %337 = vmatpush1.bf16.msra.mxu0 (!%p249_p9), %v905_v5  ;;  %v919_v22 = vld [vmem:[%s1218_s4 + $0x70] sm:$0xff] (!%p249_p9)   ;;  %v921_v24 = vld [vmem:[%s1218_s4 + $0x78] sm:$0xff] (!%p249_p9)   ;;  %v496_v26 = vld [vmem:[%s1219_s5] sm:$0xf] (!%p249_p9)  ;;  %s933_s8 = scalar_lea.vmem (!%p249_p9), %s932_s23, 256 }
  0x14   : > { %804 = vmatprep.subr.msk.mxu0 (!%p249_p9), %vm384_vm0, %v379_v6  ;;  %v920_v23 = vld [vmem:[%s1218_s4 + $0x30] sm:$0xff] (!%p249_p9)   ;;  %v922_v25 = vld [vmem:[%s1218_s4 + $0x38] sm:$0xff] (!%p249_p9)   ;;  %v298_v30 = vld [vmem:[%s1217_s3] sm:$0x3] (!%p249_p9) }
  0x15   : > { %s284_s19 = scalar_select %p283_p10, %s1056_s28, 1  ;;  %834 = vmatpush3.bf16.msra.mxu1 %v910_v11  ;;  %v303_v32 = vrot.slane %v298_v30, %v302_v29  ;;  %v307_v33 = vrot.slane %v298_v30, %v306_v31 }
  0x16   : > { %835 = vmatprep.subr.bf16.mxu1 %v911_v12 }
  0x17   : > { %s798_s29 = sshll.u32 %s284_s19, 2  ;;  %s797_s18 = sshll.u32 %s284_s19, 3 }
  0x18   : > { %s290_s17 = scalar_lea.vmem %s1215_s1, %s798_s29  ;;  %s286_s13 = scalar_lea.vmem %s1214_s0, %s797_s18 }
  0x19   : > { %v292_v10 = vld [vmem:[%s290_s17] sm:$0xf]  ;;  %836 = vmatpush3.bf16.msra.mxu1 %v912_v13  ;;  %s280_s29 = sand.u32 1, %s981_s25  }
  0x1a   : > { %803 = vmatmul.mubr.msk.bf16.vlgmr.msra.gmra.mrb[0].mxu0 %vm330_vm1, %v292_v10  ;;  %v293_v15 = vld [vmem:[%s286_s13] sm:$0xff]  ;;  %837 = vmatprep.subr.bf16.mxu1 %v913_v16  ;;  %s796_s13 = sshll.u32 %s280_s29, 3  ;;  %s708_s21 = scalar_lea.sflag [#allocation3], %s280_s29 }
  0x1b   : > { %805 = vmatpush1.msk.msra.mxu0 %vm384_vm0, %v377_v4  ;;  %453 = vmatprep.mubr.f32.mxu0 %v992_v14  ;;  %s282_s15 = scalar_lea.vmem [#allocation2], %s796_s13 }
  0x1c   : > { %853 = vmatprep.subr.mxu0 %v992_v14  ;;  %s721_s16 = sshll.u32 %s282_s15, 4  ;;  %s1173_s16 = int_to_ptr.vmem [resolvable:$true] %s721_s16 }
  0x1d   : > { %838 = vmatpush3.bf16.msra.mxu1 %v914_v17  ;;  %s927_s28 = scalar_lea.vmem %s1173_s16, 128  ;;  %p934_p0 = scmp.lt.s32.totalorder %s1173_s16, %s932_s23 }
  0x1e   : > { %839 = vmatprep.subr.bf16.mxu1 %v915_v18  ;;  %p928_p11 = scmp.ne.s32.totalorder %s1173_s16, %s927_s28  ;;  %p935_p1 = scmp.lt.s32.totalorder %s933_s8, %s927_s28 }
  0x20   : > { %p929_p12 = pnand %p928_p11, %p1073_p5  ;;  %p936_p2 = por %p935_p1, %p934_p0 }
  0x21   : > { %840 = vmatpush3.bf16.msra.mxu1 %v916_v19 }
  0x22   : > { %806 = vmatmul.mubr.msk.f32.vlgmr.msra.gmra.mrb[4].mxu0 %vm380_vm2, %v293_v15  ;;  %841 = vmatprep.subr.bf16.mxu1 %v917_v20  ;;  %p930_p13 = pneg %p929_p12 }
  0x23   : > { %854 = vmatpush3.msk.msra.mxu0 %vm384_vm0, %v496_v26  ;;  %855 = vmatprep.mubr.msk.f32.mxu0 %vm993_vm3, %v992_v14 }
  0x24   : > { %p937_p3 = pnand %p936_p2, %p930_p13 }
  0x25   : > { %842 = vmatpush3.bf16.msra.mxu1 %v918_v21 }
  0x26   : > { %843 = vmatprep.subr.bf16.mxu1 %v919_v22  ;;  %856 = vmatmul.mubr.msk.f32.vlgmr.msra.gmra.mrb[6].mxu0 %vm380_vm2, %v293_v15 }
  0x29   : > { %844 = vmatpush3.bf16.msra.mxu1 %v920_v23 }
  0x2a   : > { %845 = vmatprep.subr.bf16.mxu1 %v921_v24 }
  0x2d   : > { %846 = vmatpush3.bf16.msra.mxu1 %v922_v25 }
  0xed   : > { %v368_v34 = vpop.f32.mrb[0].mxu0 }
  0xee   : > { %v369_v35 = vadd.f32 %v368_v34, %v303_v32  ;;  %v370_v36 = vpop.f32.mrb[1].mxu0 }
  0xef   : > { %v371_v37 = vadd.f32 %v370_v36, %v307_v33  ;;  %v372_v38 = vpop.f32.mrb[2].mxu0 }
  0xf0   : > { %923 = vtanh.f32 %v369_v35  ;;  %v373_v39 = vpop.f32.mrb[3].mxu0 }
  0xf1   : > { %925 = vtanh.f32 %v371_v37 }
  0xf5   : > { %v455_v40 = vpop.f32.mrb[4].mxu0 }
  0xf6   : > { %v457_v41 = vpop.f32.mrb[5].mxu0 }
  0xf9   : > { %v566_v48 = vpop.f32.mrb[6].mxu0 }
  0xfa   : > { %v924_v42 = vpop.eup %923  ;;  %v857_v49 = vpop.f32.mrb[7].mxu0 }
  0xfb   : > { %v926_v43 = vpop.eup %925  ;;  %v460_v44 = vmul.f32 %v924_v42, %v455_v40 }
  0xfc   : > { %v461_v45 = vmul.f32 %v926_v43, %v457_v41 }
  0xfd   : > { %v462_v47 = vpack.c.bf16 %v460_v44, %v460_v44 }
  0xfe   : > { %v463_v46 = vpack.c.bf16 %v461_v45, %v461_v45 }
 0x100   : > { %698 = vmatprep.mubr.bf16.mxu1 %v463_v46 }
 0x101   : > { %699 = vmatmul.mubr.bf16.vlgmr.msra.gmra.mrb[0].mxu1 %v462_v47 }
 0x1d4   : > { %v847_v50 = vpop.f32.mrb[0].mxu1 }
 0x1d5   : > { %v848_v51 = vpop.f32.mrb[1].mxu1 }
 0x1d6   : > { %v849_v52 = vadd.f32 %v848_v51, %v847_v50  ;;  %v850_v53 = vpop.f32.mrb[2].mxu1 }
 0x1d7   : > { %v851_v54 = vpop.f32.mrb[3].mxu1 }
 0x1d8   : > { %v701_v55 = vadd.f32 %v849_v52, %v566_v48 }
 0x1da   : > { %706 = vst.msk [vmem:[%s282_s15] sm:$0xff] %vm330_vm1, %v701_v55 }
 0x1db   : > { %940 = shalt.err (!%p937_p3)
}
 0x1dc   : > { %s941_s9 = scalar_lea.hbm %s1171_s20, 128  ;;  %s945_s13 = scalar_lea.hbm %s1221_s7, 256 }
 0x1dd   : > { %p942_p4 = scmp.ne.s32.totalorder %s1171_s20, %s941_s9  ;;  %p946_p9 = scmp.lt.u32.totalorder %s1171_s20, %s1221_s7 }
 0x1de   : > { %p947_p10 = scmp.lt.u32.totalorder %s945_s13, %s941_s9  ;;  %p949_p12 = scmp.lt.u32.totalorder %s941_s9, %s1171_s20 }
 0x1df   : > { %p943_p7 = pnand %p942_p4, %p1073_p5 }
 0x1e0   : > { %p948_p11 = por %p947_p10, %p946_p9 }
 0x1e1   : > { %p944_p8 = pneg %p943_p7 }
 0x1e2   : > { %p950_p13 = por %p949_p12, %p948_p11 }
 0x1e4   : > { %p951_p0 = pnand %p950_p13, %p944_p8 }
 0x1e6   : > { %954 = shalt.err (!%p951_p0)
}
 0x1e7   : > { %858 = dma.vmem_to_hbm [thread:$0]  (%p1073_p5), %s1173_s16, 128, %s1171_s20, %s708_s21  }
 0x1e8 PF: > { %p864_p1 = scmp.ge.s32.totalorder %s989_s27, 2  ;;  %s733_s17 = sand.u32 1, %s977_s24  }
 0x1e9   : > { %s734_s18 = scalar_lea.sflag [#allocation3], %s733_s17 }
 0x1ea   : > { %p861_p2 = pnand %p864_p1, %p1077_p6 }
 0x1ec   : > { %972 = dma.done.wait (!%p861_p2), %s734_s18, 128  }
 0x1ed   : > { %974 = vsyncadd (!%p861_p2), %s734_s18, 4294967168  ;;  %p17_p3 = scmp.ge.s32.totalorder %s1060_s30, 4   ;;  %s1224_s24 = smov %s981_s25 }
 0x1ee   : > { %s1225_s25 = smov %s985_s26  ;;  %s1226_s26 = smov %s1071_s10 }
 0x1ef   : > { %s1227_s27 = smov %s1060_s30  ;;  %19 = sbr.rel (!%p17_p3) target bundleno = 3 (0x3), region = 86 }
 0x1f6   :  { %739 = vsyncpa [#allocation3], 1 }
 0x1f7   :  { %741 = vsyncpa [#allocation3 + $0x1], 1 }

</bundles_post_ra>
